<compile_context>
chip_gen: v7x
topology: tpu7x:2x2x1
jax: 0.10.0
libtpu: 0.0.40
codegen_flags: <defaults>
</compile_context>

<pallas_src>
import functools

import jax
import jax.numpy as jnp
from jax.experimental import pallas as pl
from jax.experimental.pallas import tpu as pltpu


def _round_up(x, m):
    return ((x + m - 1) // m) * m


def _actor_critic_fused_kernel(n_actions, x_ref, w1_ref, b1_ref, w2_ref, b2_ref,
                               probs_ref, value_ref):
    # ---- fused first layer: h = relu(x @ [W1a | W1c] + [b1a | b1c]) ----
    x = x_ref[...].astype(w1_ref.dtype)
    h = jnp.dot(x, w1_ref[...], preferred_element_type=jnp.float32) + b1_ref[...]
    h = jnp.maximum(h, 0.0)

    # ---- fused heads: y = h @ W2_blockdiag + b2 -> (tile_b, 128) ----
    # lanes [0, n_actions) = actor logits, lane n_actions = critic value,
    # lanes > n_actions are exactly zero (zero-padded weights/bias).
    y = jnp.dot(h.astype(w2_ref.dtype), w2_ref[...],
                preferred_element_type=jnp.float32) + b2_ref[...]

    lane = jax.lax.broadcasted_iota(jnp.int32, y.shape, 1)
    is_logit = lane < n_actions

    # masked, numerically-stable softmax over the logit lanes only.
    # NOTE: normalization must be exact (no approx reciprocal) so every row
    # sums to 1 tightly for Categorical sampling / log_prob.
    # Keep the jnp.where select (not a multiply-by-mask) so the exp evaluated
    # on non-logit lanes is cleanly discarded.
    m = jnp.max(jnp.where(is_logit, y, -jnp.inf), axis=1, keepdims=True)
    e = jnp.where(is_logit, jnp.exp(y - m), 0.0)
    inv_denom = 1.0 / jnp.sum(e, axis=1, keepdims=True)   # (tb, 1), exact
    probs = e * inv_denom

    # Narrow stores: block last dims equal the full output dims (n_actions, 1)
    # -> ~25x fewer HBM writeback bytes than a 128-wide f32 slab.
    probs_ref[...] = probs[:, :n_actions].astype(probs_ref.dtype)
    value_ref[...] = y[:, n_actions:n_actions + 1].astype(value_ref.dtype)


def fuse_params(params, n_actions, *, param_dtype=jnp.float32):
    """Build the fused/padded weights once, outside the per-step call.

    Pass param_dtype=jnp.bfloat16 (and bf16 x) to halve input DMA bytes;
    matmuls accumulate in f32 either way.
    """
    H = params["w1a"].shape[1]
    out_pad = _round_up(n_actions + 1, 128)  # lane width of the fused head matmul

    w1 = jnp.concatenate([params["w1a"], params["w1c"]], axis=1)   # (S, 2H)
    b1 = jnp.concatenate([params["b1a"], params["b1c"]], axis=1)   # (1, 2H)

    # Block-diagonal, zero-padded second layer. Padding columns must stay
    # exactly zero so critic weights never leak into the actor logits.
    w2 = jnp.zeros((2 * H, out_pad), jnp.float32)
    w2 = w2.at[:H, :n_actions].set(params["w2a"])
    w2 = w2.at[H:, n_actions].set(params["w2c"][:, 0])
    b2 = jnp.zeros((1, out_pad), jnp.float32)
    b2 = b2.at[:, :n_actions].set(params["b2a"][0])
    b2 = b2.at[:, n_actions].set(params["b2c"][0, 0])
    return dict(w1=w1.astype(param_dtype), b1=b1.astype(jnp.float32),
                w2=w2.astype(param_dtype), b2=b2.astype(jnp.float32))


_MIN_SPLIT_ROWS = 256  # below ~2x this, one grid step is cheapest everywhere


def actor_critic_forward(x, fused, n_actions, *, tile_b=1024):
    """x: (B, n_states). fused: output of fuse_params(). Returns (probs, value)."""
    B, n_states = x.shape
    two_hidden = fused["w1"].shape[1]
    out_pad = fused["w2"].shape[1]

    # Hard cap keeps the (lane-padded to 128) x/probs/value double-buffers
    # well under v5e's 16 MiB scoped-VMEM default; no vmem_limit_bytes needed.
    tile_b = min(tile_b, 2048)

    b8 = _round_up(B, 8)
    if b8 <= tile_b and b8 <= 2 * _MIN_SPLIT_ROWS:
        tb = b8                                   # small batch: single grid step
    else:
        # Even number of grid steps (>= 2), tb <= tile_b: the "parallel" batch
        # axis then splits evenly over v7x's two TensorCores.
        half_steps = max(1, pl.cdiv(b8, 2 * tile_b))
        tb = _round_up(pl.cdiv(b8, 2 * half_steps), 8)
    b_pad = _round_up(b8, tb)
    if b_pad != B:
        x = jnp.pad(x, ((0, b_pad - B), (0, 0)))

    probs, value = pl.pallas_call(
        functools.partial(_actor_critic_fused_kernel, n_actions),
        out_shape=(
            jax.ShapeDtypeStruct((b_pad, n_actions), jnp.float32),
            jax.ShapeDtypeStruct((b_pad, 1), jnp.float32),
        ),
        grid=(b_pad // tb,),
        in_specs=[
            pl.BlockSpec((tb, n_states), lambda i: (i, 0)),          # x row tile
            pl.BlockSpec((n_states, two_hidden), lambda i: (0, 0)),  # W1 resident
            pl.BlockSpec((1, two_hidden), lambda i: (0, 0)),         # b1 resident
            pl.BlockSpec((two_hidden, out_pad), lambda i: (0, 0)),   # W2 resident
            pl.BlockSpec((1, out_pad), lambda i: (0, 0)),            # b2 resident
        ],
        out_specs=(
            pl.BlockSpec((tb, n_actions), lambda i: (i, 0)),
            pl.BlockSpec((tb, 1), lambda i: (i, 0)),
        ),
        compiler_params=pltpu.CompilerParams(
            dimension_semantics=("parallel",)),  # batch axis -> both v7x TCs
    )(x, fused["w1"], fused["b1"], fused["w2"], fused["b2"])

    # Drop padded batch rows only (garbage rows are never returned).
    return probs[:B], value[:B]


def init_params(key, n_states, n_actions, hidden_dim):
    """Deterministic synthetic init (uniform, PyTorch-Linear-like fan_in scaling)."""
    ks = jax.random.split(key, 8)

    def lin(kw, kb, fan_in, fan_out):
        bound = 1.0 / jnp.sqrt(fan_in)
        w = jax.random.uniform(kw, (fan_in, fan_out), jnp.float32, -bound, bound)
        b = jax.random.uniform(kb, (1, fan_out), jnp.float32, -bound, bound)
        return w, b

    w1a, b1a = lin(ks[0], ks[1], n_states, hidden_dim)
    w2a, b2a = lin(ks[2], ks[3], hidden_dim, n_actions)
    w1c, b1c = lin(ks[4], ks[5], n_states, hidden_dim)
    w2c, b2c = lin(ks[6], ks[7], hidden_dim, 1)
    return dict(w1a=w1a, b1a=b1a, w2a=w2a, b2a=b2a,
                w1c=w1c, b1c=b1c, w2c=w2c, b2c=b2c)


def _reference_forward(x, params):
    """Pure-JAX reference of the PyTorch module's forward (HIGHEST precision
    so the reference's own MXU rounding doesn't widen the comparison)."""
    hp = jax.lax.Precision.HIGHEST
    h_a = jnp.maximum(jnp.dot(x, params["w1a"], precision=hp) + params["b1a"], 0.0)
    logits = jnp.dot(h_a, params["w2a"], precision=hp) + params["b2a"]
    probs = jax.nn.softmax(logits, axis=1)
    h_c = jnp.maximum(jnp.dot(x, params["w1c"], precision=hp) + params["b1c"], 0.0)
    value = jnp.dot(h_c, params["w2c"], precision=hp) + params["b2c"]
    return probs, value


if __name__ == "__main__":
    key = jax.random.PRNGKey(0)
    n_states, n_actions, hidden_dim, batch = 16, 4, 32, 8

    k_x, k_p = jax.random.split(key)
    x = jax.random.normal(k_x, (batch, n_states), jnp.float32)
    params = init_params(k_p, n_states, n_actions, hidden_dim)
    fused = fuse_params(params, n_actions)  # hoisted out of the hot path

    probs, value = actor_critic_forward(x, fused, n_actions)
    jax.block_until_ready((probs, value))

    # sanity: shapes, exact-ish normalization, agreement with pure-JAX reference
    assert probs.shape == (batch, n_actions)
    assert value.shape == (batch, 1)
    assert jnp.allclose(jnp.sum(probs, axis=1), 1.0, atol=1e-3)
    probs_ref, value_ref = _reference_forward(x, params)
    assert jnp.allclose(probs, probs_ref, atol=2e-3)
    assert jnp.allclose(value, value_ref, atol=1e-3)

    # TODO(synk): torch.distributions.Categorical sampling/log_prob is host-side
    # glue; the kernel returns the softmax probabilities that parameterize it.
    print("KERNEL_OK")
</pallas_src>

<mosaic_0001>
module attributes {stable_mosaic.version = 11 : i64} {
  func.func @_actor_critic_fused_kernel(%arg0: i32, %arg1: memref<8x16xf32, #tpu.memory_space<vmem>>, %arg2: memref<16x64xf32, #tpu.memory_space<vmem>>, %arg3: memref<1x64xf32, #tpu.memory_space<vmem>>, %arg4: memref<64x128xf32, #tpu.memory_space<vmem>>, %arg5: memref<1x128xf32, #tpu.memory_space<vmem>>, %arg6: memref<8x4xf32, #tpu.memory_space<vmem>>, %arg7: memref<8x1xf32, #tpu.memory_space<vmem>>) attributes {dimension_semantics = [#tpu.dimension_semantics<parallel>], iteration_bounds = array<i64: 1>, scalar_prefetch = 0 : i64, scratch_operands = 0 : i64, tpu.core_type = #tpu.core_type<tc>, window_params = [{transform_indices = @transform_0, window_bounds = array<i64: 8, 16>}, {pipeline_mode = #tpu.pipeline_mode<synchronous>, transform_indices = @transform_1, window_bounds = array<i64: 16, 64>}, {pipeline_mode = #tpu.pipeline_mode<synchronous>, transform_indices = @transform_2, window_bounds = array<i64: 1, 64>}, {pipeline_mode = #tpu.pipeline_mode<synchronous>, transform_indices = @transform_3, window_bounds = array<i64: 64, 128>}, {pipeline_mode = #tpu.pipeline_mode<synchronous>, transform_indices = @transform_4, window_bounds = array<i64: 1, 128>}, {transform_indices = @transform_5, window_bounds = array<i64: 8, 4>}, {transform_indices = @transform_6, window_bounds = array<i64: 8, 1>}]} {
    %c0 = arith.constant 0 : index
    %c0_0 = arith.constant 0 : index
    %0 = vector.load %arg1[%c0, %c0_0] : memref<8x16xf32, #tpu.memory_space<vmem>>, vector<8x16xf32>
    %c0_1 = arith.constant 0 : index
    %c0_2 = arith.constant 0 : index
    %1 = vector.load %arg2[%c0_1, %c0_2] : memref<16x64xf32, #tpu.memory_space<vmem>>, vector<16x64xf32>
    %cst = arith.constant dense<0.000000e+00> : vector<8x64xf32>
    %2 = tpu.matmul %0, %1, %cst {dimension_numbers = #tpu.dot_dimension_numbers<[1], [0], [0], [1], [0, 0, 1, 1], [], []>} : vector<8x16xf32>, vector<16x64xf32>, vector<8x64xf32> -> vector<8x64xf32>
    %c0_3 = arith.constant 0 : index
    %c0_4 = arith.constant 0 : index
    %3 = vector.load %arg3[%c0_3, %c0_4] : memref<1x64xf32, #tpu.memory_space<vmem>>, vector<1x64xf32>
    %4 = vector.broadcast %3 : vector<1x64xf32> to vector<8x64xf32>
    %5 = arith.addf %2, %4 : vector<8x64xf32>
    %cst_5 = arith.constant 0.000000e+00 : f32
    %6 = vector.broadcast %cst_5 : f32 to vector<8x64xf32>
    %7 = arith.maximumf %5, %6 : vector<8x64xf32>
    %c0_6 = arith.constant 0 : index
    %c0_7 = arith.constant 0 : index
    %8 = vector.load %arg4[%c0_6, %c0_7] : memref<64x128xf32, #tpu.memory_space<vmem>>, vector<64x128xf32>
    %cst_8 = arith.constant dense<0.000000e+00> : vector<8x128xf32>
    %9 = tpu.matmul %7, %8, %cst_8 {dimension_numbers = #tpu.dot_dimension_numbers<[1], [0], [0], [1], [0, 0, 1, 1], [], []>} : vector<8x64xf32>, vector<64x128xf32>, vector<8x128xf32> -> vector<8x128xf32>
    %c0_9 = arith.constant 0 : index
    %c0_10 = arith.constant 0 : index
    %10 = vector.load %arg5[%c0_9, %c0_10] : memref<1x128xf32, #tpu.memory_space<vmem>>, vector<1x128xf32>
    %11 = vector.broadcast %10 : vector<1x128xf32> to vector<8x128xf32>
    %12 = arith.addf %9, %11 : vector<8x128xf32>
    %13 = tpu.iota {dimensions = array<i32: 1>} : vector<8x128xi32>
    %c4_i32 = arith.constant 4 : i32
    %14 = vector.broadcast %c4_i32 : i32 to vector<8x128xi32>
    %15 = arith.cmpi slt, %13, %14 : vector<8x128xi32>
    %cst_11 = arith.constant 0xFF800000 : f32
    %16 = vector.broadcast %cst_11 : f32 to vector<8x128xf32>
    %17 = arith.select %15, %12, %16 : vector<8x128xi1>, vector<8x128xf32>
    %cst_12 = arith.constant dense<0xFF800000> : vector<8xf32>
    %18 = vector.multi_reduction <maximumf>, %17, %cst_12 [1] : vector<8x128xf32> to vector<8xf32>
    %19 = vector.shape_cast %18 : vector<8xf32> to vector<8x1xf32>
    %20 = vector.broadcast %19 : vector<8x1xf32> to vector<8x128xf32>
    %21 = arith.subf %12, %20 : vector<8x128xf32>
    %22 = math.exp %21 : vector<8x128xf32>
    %cst_13 = arith.constant 0.000000e+00 : f32
    %23 = vector.broadcast %cst_13 : f32 to vector<8x128xf32>
    %24 = arith.select %15, %22, %23 : vector<8x128xi1>, vector<8x128xf32>
    %cst_14 = arith.constant dense<0.000000e+00> : vector<8xf32>
    %25 = vector.multi_reduction <add>, %24, %cst_14 [1] : vector<8x128xf32> to vector<8xf32>
    %26 = vector.shape_cast %25 : vector<8xf32> to vector<8x1xf32>
    %cst_15 = arith.constant 1.000000e+00 : f32
    %27 = vector.broadcast %cst_15 : f32 to vector<8x1xf32>
    %28 = arith.divf %27, %26 : vector<8x1xf32>
    %29 = vector.broadcast %28 : vector<8x1xf32> to vector<8x128xf32>
    %30 = arith.mulf %24, %29 : vector<8x128xf32>
    %31 = vector.extract_strided_slice %30 {offsets = [0, 0], sizes = [8, 4], strides = [1, 1]} : vector<8x128xf32> to vector<8x4xf32>
    %c0_16 = arith.constant 0 : index
    %c0_17 = arith.constant 0 : index
    %32 = vector.load %arg6[%c0_16, %c0_17] : memref<8x4xf32, #tpu.memory_space<vmem>>, vector<8x4xf32>
    tpu.vector_store %arg6[%c0_16, %c0_17], %31 {strides = array<i32>} : memref<8x4xf32, #tpu.memory_space<vmem>>, vector<8x4xf32>,
    %33 = vector.extract_strided_slice %12 {offsets = [0, 4], sizes = [8, 1], strides = [1, 1]} : vector<8x128xf32> to vector<8x1xf32>
    %c0_18 = arith.constant 0 : index
    %c0_19 = arith.constant 0 : index
    %34 = vector.load %arg7[%c0_18, %c0_19] : memref<8x1xf32, #tpu.memory_space<vmem>>, vector<8x1xf32>
    tpu.vector_store %arg7[%c0_18, %c0_19], %33 {strides = array<i32>} : memref<8x1xf32, #tpu.memory_space<vmem>>, vector<8x1xf32>,
    return
  }
  func.func @transform_0(%arg0: i32) -> (i32, i32) {
    %c0_i32 = arith.constant 0 : i32
    %c0_i32_0 = arith.constant 0 : i32
    return %arg0, %c0_i32 : i32, i32
  }
  func.func @transform_1(%arg0: i32) -> (i32, i32) {
    %c0_i32 = arith.constant 0 : i32
    %c0_i32_0 = arith.constant 0 : i32
    %c0_i32_1 = arith.constant 0 : i32
    return %c0_i32, %c0_i32_0 : i32, i32
  }
  func.func @transform_2(%arg0: i32) -> (i32, i32) {
    %c0_i32 = arith.constant 0 : i32
    %c0_i32_0 = arith.constant 0 : i32
    %c0_i32_1 = arith.constant 0 : i32
    return %c0_i32, %c0_i32_0 : i32, i32
  }
  func.func @transform_3(%arg0: i32) -> (i32, i32) {
    %c0_i32 = arith.constant 0 : i32
    %c0_i32_0 = arith.constant 0 : i32
    %c0_i32_1 = arith.constant 0 : i32
    return %c0_i32, %c0_i32_0 : i32, i32
  }
  func.func @transform_4(%arg0: i32) -> (i32, i32) {
    %c0_i32 = arith.constant 0 : i32
    %c0_i32_0 = arith.constant 0 : i32
    %c0_i32_1 = arith.constant 0 : i32
    return %c0_i32, %c0_i32_0 : i32, i32
  }
  func.func @transform_5(%arg0: i32) -> (i32, i32) {
    %c0_i32 = arith.constant 0 : i32
    %c0_i32_0 = arith.constant 0 : i32
    return %arg0, %c0_i32 : i32, i32
  }
  func.func @transform_6(%arg0: i32) -> (i32, i32) {
    %c0_i32 = arith.constant 0 : i32
    %c0_i32_0 = arith.constant 0 : i32
    return %arg0, %c0_i32 : i32, i32
  }
}

</mosaic_0001>

<bundles_post_ra>
// kernel: tpu_custom_call.1
= control target key start
LH: loop header
LB: loop body
LE: loop exit
PB: predicated region body
PF: predicated region fallthrough
CT: control target
= control target key end

     0   :  { %12 = vsyncpa [#allocation3], 0  ;;  %s506_s0 = inlined_call_operand.hbm [shape: f32[8,16], index: 0, kind: input, shape index: {}]   ;;  %s507_s1 = inlined_call_operand.hbm [shape: f32[16,64], index: 1, kind: input, shape index: {}]   ;;  %s508_s2 = inlined_call_operand.vmem [shape: f32[1,64], index: 2, kind: input, shape index: {}]   ;;  %s509_s3 = inlined_call_operand.hbm [shape: f32[64,128], index: 3, kind: input, shape index: {}]   ;;  %s510_s4 = inlined_call_operand.vmem [shape: f32[1,128], index: 4, kind: input, shape index: {}]   ;;  %s511_s5 = inlined_call_operand.vmem [shape: f32[8,4], index: 5, kind: output, shape index: {0}]   ;;  %s512_s6 = inlined_call_operand.vmem [shape: f32[8,1], index: 6, kind: output, shape index: {1}]  }
   0x1   :  { %13 = vsyncpa [#allocation5], 0  ;;  %s408_s21 = smov [#allocation4]   ;;  %s338_s25 = scalar_lea.hbm %s507_s1, 256 }
   0x2   :  { %s29_s22 = sshll.u32 %s408_s21, 4  ;;  %p339_p0 = scmp.ne.s32.totalorder %s507_s1, %s338_s25  ;;  %s30_s22 = int_to_ptr.vmem [resolvable:$true] %s29_s22 }
   0x3   :  { %p342_p1 = scmp.lt.u32.totalorder %s338_s25, %s507_s1 }
   0x5   :  { %p344_p2 = pnand %p342_p1, %p339_p0 }
   0x7   :  { %347 = shalt.err (!%p344_p2)
}
   0x8   :  { %s348_s30 = scalar_lea.vmem %s30_s22, 256  ;;  %p353_p4 = scmp.lt.s32.totalorder %s30_s22, %s30_s22 }
   0x9   :  { %p349_p3 = scmp.ne.s32.totalorder %s30_s22, %s348_s30  ;;  %p354_p5 = scmp.lt.s32.totalorder %s348_s30, %s348_s30 }
   0xb   :  { %p355_p6 = por %p354_p5, %p353_p4 }
   0xd   :  { %p356_p7 = pnand %p355_p6, %p349_p3 }
   0xf   :  { %359 = shalt.err (!%p356_p7)
}
  0x10   :  { %s409_s7 = smov 128   ;;  %s410_s8 = smov 8  }
  0x11   :  { %35 = dma.hbm_to_vmem [thread:$0]  %s507_s1, 256, %s30_s22, [#allocation5], %s409_s7, %s409_s7, %s410_s8  }
  0x12   :  { %s411_s11 = smov [#allocation2]   ;;  %s412_s13 = smov [#allocation6]  }
  0x13   :  { %s20_s12 = sshll.u32 %s411_s11, 4  ;;  %s43_s14 = sshll.u32 %s412_s13, 4  ;;  %s21_s12 = int_to_ptr.vmem [resolvable:$true] %s20_s12  ;;  %s44_s14 = int_to_ptr.vmem [resolvable:$true] %s43_s14 }
  0x14   :  { %s360_s17 = scalar_lea.hbm %s506_s0, 128 }
  0x15   :  { %p361_p8 = scmp.ne.s32.totalorder %s506_s0, %s360_s17  ;;  %p364_p9 = scmp.lt.u32.totalorder %s360_s17, %s506_s0 }
  0x17   :  { %p366_p10 = pnand %p364_p9, %p361_p8 }
  0x19   :  { %369 = shalt.err (!%p366_p10)
}
  0x1a   :  { %s370_s1 = scalar_lea.vmem %s21_s12, 128  ;;  %p375_p12 = scmp.lt.s32.totalorder %s21_s12, %s21_s12 }
  0x1b   :  { %p371_p11 = scmp.ne.s32.totalorder %s21_s12, %s370_s1  ;;  %p376_p13 = scmp.lt.s32.totalorder %s370_s1, %s370_s1 }
  0x1d   :  { %p377_p0 = por %p376_p13, %p375_p12 }
  0x1f   :  { %p378_p1 = pnand %p377_p0, %p371_p11 }
  0x21   :  { %381 = shalt.err (!%p378_p1)
}
  0x22   :  { %23 = dma.hbm_to_vmem [thread:$0]  %s506_s0, 128, %s21_s12, [#allocation3]  }
  0x23   :  { %s382_s26 = scalar_lea.hbm %s509_s3, 1024 }
  0x24   :  { %p383_p2 = scmp.ne.s32.totalorder %s509_s3, %s382_s26  ;;  %p386_p3 = scmp.lt.u32.totalorder %s382_s26, %s509_s3 }
  0x26   :  { %p388_p4 = pnand %p386_p3, %p383_p2 }
  0x28   :  { %391 = shalt.err (!%p388_p4)
}
  0x29   :  { %s392_s9 = scalar_lea.vmem %s44_s14, 1024  ;;  %p397_p6 = scmp.lt.s32.totalorder %s44_s14, %s44_s14 }
  0x2a   :  { %p393_p5 = scmp.ne.s32.totalorder %s44_s14, %s392_s9  ;;  %p398_p7 = scmp.lt.s32.totalorder %s392_s9, %s392_s9 }
  0x2c   :  { %p399_p8 = por %p398_p7, %p397_p6 }
  0x2e   :  { %p400_p9 = pnand %p399_p8, %p393_p5 }
  0x30   :  { %403 = shalt.err (!%p400_p9)
}
  0x31   :  { %49 = dma.hbm_to_vmem [thread:$0]  %s509_s3, 1024, %s44_s14, [#allocation5], %s409_s7, %s409_s7, %s410_s8  }
  0x32   :  { %404 = dma.done.wait [#allocation3], 128  }
  0x33   :  { %405 = vsyncadd [#allocation3], 4294967168 }
  0x34   :  { %406 = dma.done.wait [#allocation5], 1280  }
  0x35   :  { %407 = vsyncadd [#allocation5], 4294966016  ;;  %v413_v0 = vmov 0.0|0.0   ;;  %vm414_vm0 = vmmov 0   ;;  %v415_v1 = vmov 0.0   ;;  %v62_v2 = vld [vmem:[#allocation4] sm:$0xff]  ;;  %v235_v23 = vlaneseq }
  0x36   :  { %310 = vmatprep.subr.bf16.mxu0 %v413_v0  ;;  %288 = vmatprep.mubr.msk.f32.mxu0 %vm414_vm0, %v415_v1  ;;  %v63_v3 = vld [vmem:[#allocation4 + $0x8] sm:$0xff]  ;;  %v146_v5 = vld [vmem:[#allocation6] sm:$0xff]  ;;  %v147_v6 = vld [vmem:[#allocation6 + $0x8] sm:$0xff]  ;;  %vm71_vm1 = vcmask 130048   ;;  %vm161_vm2 = vcmask 523264   ;;  %s416_s12 = smov 124  }
  0x37   :  { %313 = vmatprep.subr.bf16.mxu1 %v413_v0  ;;  %307 = vmatprep.mubr.msk.f32.mxu1 %vm414_vm0, %v415_v1  ;;  %v311_v4 = vpack.c.bf16 %v63_v3, %v62_v2  ;;  %v148_v7 = vld [vmem:[#allocation6 + $0x10] sm:$0xff]  ;;  %v314_v8 = vpack.c.bf16 %v147_v6, %v146_v5  ;;  %v149_v9 = vld [vmem:[#allocation6 + $0x18] sm:$0xff]  ;;  %v61_v10 = vld [vmem:[#allocation2] sm:$0xff]  ;;  %v236_v24 = vand.u32 127, %v235_v23  ;;  %vm256_vm4 = vcmask 7168  }
  0x38   :  { %v317_v11 = vpack.c.bf16 %v149_v9, %v148_v7  ;;  %v150_v12 = vld [vmem:[#allocation6 + $0x20] sm:$0xff]  ;;  %v151_v13 = vld [vmem:[#allocation6 + $0x28] sm:$0xff]  ;;  %v152_v15 = vld [vmem:[#allocation6 + $0x30] sm:$0xff]  ;;  %vm250_vm5 = vcmask 31744  }
  0x39   :  { %312 = vmatpush3.bf16.msra.mxu0 %v311_v4  ;;  %315 = vmatpush3.bf16.msra.mxu1 %v314_v8  ;;  %v320_v14 = vpack.c.bf16 %v151_v13, %v150_v12  ;;  %v153_v16 = vld [vmem:[#allocation6 + $0x38] sm:$0xff]  ;;  %v268_v18 = vld [vmem:[%s508_s2] ss:$0 sm:$0xff]  ;;  %vm237_vm3 = vcmp.lt.s32.totalorder %v236_v24, 4 }
  0x3a   :  { %316 = vmatprep.subr.bf16.mxu1 %v413_v0  ;;  %v323_v17 = vpack.c.bf16 %v153_v16, %v152_v15  ;;  %v270_v25 = vld [vmem:[%s510_s4] ss:$0 sm:$0xff] }
  0x3c   :  { %289 = vmatmul.mubr.msk.f32.vlgmr.msra.gmra.mrb[0].mxu0 %vm71_vm1, %v61_v10 }
  0x3d   :  { %318 = vmatpush3.bf16.msra.mxu1 %v317_v11 }
  0x3e   :  { %319 = vmatprep.subr.bf16.mxu1 %v413_v0 }
  0x41   :  { %321 = vmatpush3.bf16.msra.mxu1 %v320_v14 }
  0x42   :  { %322 = vmatprep.subr.bf16.mxu1 %v413_v0 }
  0x45   :  { %324 = vmatpush3.bf16.msra.mxu1 %v323_v17 }
 0x10f   :  { %v141_v19 = vpop.f32.mrb[0].mxu0 }
 0x110   :  { %v142_v20 = vadd.f32 %v268_v18, %v141_v19  ;;  %v290_v21 = vpop.f32.mrb[1].mxu0 }
 0x112   :  { %v145_v22 = vmax.f32 %v142_v20, 0.0 }
 0x114   :  { %308 = vmatmul.mubr.msk.f32.vlgmr.msra.gmra.mrb[0].mxu1 %vm161_vm2, %v145_v22 }
 0x1e7   :  { %v231_v26 = vpop.f32.mrb[0].mxu1 }
 0x1e8   :  { %v232_v27 = vadd.f32 %v270_v25, %v231_v26  ;;  %v309_v28 = vpop.f32.mrb[1].mxu1 }
 0x1ea   :  { %253 = vrot.lane.b32.xlu1 %v232_v27, %s416_s12  ;;  %v238_v29 = vsel %vm237_vm3, %v232_v27, -inf }
 0x1eb   :  { %239 = vmax.xlane.f32.xlu0 %v238_v29 }
 0x25c   :  { %v254_v30 = vpop.permute.xlu1 %253 }
 0x25d   :  { %257 = vst.msk [vmem:[%s512_s6] sm:$0xff] %vm256_vm4, %v254_v30 }
 0x278   :  { %v240_v31 = vpop.xlane.xlu0 %239 }
 0x279   :  { %v241_v32 = vsub.f32 %v232_v27, %v240_v31 }
 0x27b   :  { %v242_v33 = vmul.f32 1.442695, %v241_v32 }
 0x27d   :  { %334 = vpow2.f32 %v242_v33 }
 0x287   :  { %v335_v34 = vpop.eup %334 }
 0x288   :  { %v244_v35 = vsel %vm237_vm3, %v335_v34, 0.0 }
 0x289   :  { %245 = vadd.xlane.f32.xlu0 %v244_v35 }
 0x316   :  { %v246_v36 = vpop.xlane.xlu0 %245 }
 0x317   :  { %336 = vrcp.f32 %v246_v36 }
 0x321   :  { %v337_v37 = vpop.eup %336 }
 0x322   :  { %v249_v38 = vmul.f32 %v337_v37, %v244_v35 }
 0x324   :  { %251 = vst.msk [vmem:[%s511_s5] sm:$0xff] %vm250_vm5, %v249_v38 }
 0x325   :  { %266 = vsyncpa [#allocation3], 1 }
 0x326   :  { %267 = vsyncpa [#allocation5], 1 }

</bundles_post_ra>
